<compile_context>
chip_gen: v5e
topology: v5e:2x2
jax: 0.10.0
libtpu: 0.0.40
codegen_flags: <defaults>
</compile_context>

<pallas_src>
import functools

import numpy as np
import jax
import jax.numpy as jnp
from jax import lax
from jax.experimental import pallas as pl
from jax.experimental.pallas import tpu as pltpu

BN_EPS = 1e-5


# ---------------------------------------------------------------------------
# Fused kernel: spatial amax + Linear + BatchNorm1d (batch stats) + residual.
# ---------------------------------------------------------------------------
def _fused_proj_kernel(nm_ref, w_ref, g_ref, beta_ref, emb_ref, o_ref, *,
                       B, C, counts):
    # nm_ref  : (B*C, H*W)  noise maps, spatial axis last (lane-dim reduce)
    # w_ref   : (C, D)      fc.weight.T
    # g_ref   : (1, D)      bn.gamma
    # beta_ref: (1, D)      bn.beta
    # emb_ref : (N, D)      residual input (aliased with o_ref)
    # o_ref   : (N, D)

    # Spatial amax over the lane axis: (B*C, S) -> (B*C, 1).
    nv = jnp.max(nm_ref[...], axis=1, keepdims=True)

    # Projection as unrolled VPU broadcast-FMAs (C tiny -> MXU would pad a
    # (B,C)@(C,D) f32 dot to a full 128/256-wide multi-pass). fc bias omitted:
    # train-mode BN subtracts the batch mean, cancelling it exactly.
    z_rows = []
    for b in range(B):
        zb = nv[b * C:b * C + 1, :] * w_ref[0:1, :]               # (1, D)
        for c in range(1, C):
            zb = zb + nv[b * C + c:b * C + c + 1, :] * w_ref[c:c + 1, :]
        z_rows.append(zb)

    # Counts-weighted stats over the B unique rows == biased batch stats over
    # the N repeat_interleave'd rows; weights are trace-time Python floats.
    n_total = float(sum(counts))
    wts = [cnt / n_total for cnt in counts]
    mean = z_rows[0] * wts[0]
    for b in range(1, B):
        mean = mean + z_rows[b] * wts[b]
    var = ((z_rows[0] - mean) ** 2) * wts[0]
    for b in range(1, B):
        var = var + ((z_rows[b] - mean) ** 2) * wts[b]

    scale = g_ref[...] * lax.rsqrt(var + BN_EPS)                  # (1, D)
    shift = beta_ref[...] - mean * scale                          # (1, D)

    # repeat_interleave + residual: statically-unrolled per-map writes; row b is
    # sublane-broadcast across its counts[b] destination rows. No MXU anywhere.
    off = 0
    for b, cnt in enumerate(counts):
        y_b = z_rows[b] * scale + shift                           # (1, D)
        o_ref[off:off + cnt, :] = (emb_ref[off:off + cnt, :]
                                   + y_b).astype(o_ref.dtype)
        off += cnt


def linear_projection_forward(embeddings, noise_maps, num_embs_per_map, params):
    """embeddings: (N, D); noise_maps: (B, C, H, W); num_embs_per_map: list[int]."""
    w_t, _b, gamma, beta = params   # fc.bias is a no-op under train-mode BN
    B, C, H, W = noise_maps.shape
    N, D = embeddings.shape
    counts = tuple(int(c) for c in num_embs_per_map)
    assert len(counts) == B and sum(counts) == N
    # NOTE: counts are trace-time constants; changing them between calls
    # retraces/recompiles.

    # Sublane-dense noise-map operand; reshape of the contiguous array is free.
    nm = noise_maps.reshape(B * C, H * W)

    kernel = functools.partial(_fused_proj_kernel, B=B, C=C, counts=counts)

    flops = 2 * B * C * D + 12 * B * D + 2 * N * D
    bytes_accessed = 4 * (B * C * H * W + C * D + 2 * D + 2 * N * D)

    return pl.pallas_call(
        kernel,
        out_shape=jax.ShapeDtypeStruct((N, D), embeddings.dtype),
        grid=(1,),
        in_specs=[
            pl.BlockSpec((B * C, H * W), lambda i: (0, 0)),
            pl.BlockSpec((C, D), lambda i: (0, 0)),
            pl.BlockSpec((1, D), lambda i: (0, 0)),
            pl.BlockSpec((1, D), lambda i: (0, 0)),
            pl.BlockSpec((N, D), lambda i: (0, 0)),
        ],
        out_specs=pl.BlockSpec((N, D), lambda i: (0, 0)),
        # In-place residual: embeddings (operand index 4) aliases output 0.
        input_output_aliases={4: 0},
        compiler_params=pltpu.CompilerParams(
            dimension_semantics=("arbitrary",),
            # No vmem_limit_bytes override: footprint << 1 MiB; 64 MiB would
            # claim all of v7x's per-TC VMEM.
        ),
        cost_estimate=pl.CostEstimate(
            flops=int(flops), transcendentals=int(D),
            bytes_accessed=int(bytes_accessed)),
    )(nm, w_t, gamma.reshape(1, D), beta.reshape(1, D), embeddings)


# ---------------------------------------------------------------------------
# Pure-JAX reference (mirrors the PyTorch forward, train-mode BN, incl. bias).
# ---------------------------------------------------------------------------
def reference_forward(embeddings, noise_maps, num_embs_per_map, params):
    w_t, b, gamma, beta = params
    nv = jnp.max(noise_maps, axis=(2, 3))
    idx = np.repeat(np.arange(len(num_embs_per_map)), num_embs_per_map)
    nv = nv[idx]
    z = nv @ w_t + b
    mean = z.mean(axis=0)
    var = ((z - mean) ** 2).mean(axis=0)
    y = (z - mean) / jnp.sqrt(var + BN_EPS) * gamma + beta
    return embeddings + y


if __name__ == "__main__":
    # Small, deterministic setup consistent with the module:
    #   dim = 32, memery_channels = 4, 2 noise maps of 16x16, 3 + 5 embeddings.
    dim = 32
    memery_channels = 4
    B, H, W = 2, 16, 16
    num_embs_per_map = [3, 5]
    N = sum(num_embs_per_map)

    key = jax.random.PRNGKey(0)
    k_emb, k_maps, k_w = jax.random.split(key, 3)

    embeddings = jax.random.normal(k_emb, (N, dim), dtype=jnp.float32)
    noise_maps = jax.random.normal(k_maps, (B, memery_channels, H, W),
                                   dtype=jnp.float32)

    # Parameters (deterministic, matching reset_parameters()):
    #   fc.weight ~ N(0, 0.01), fc.bias = 0, bn.gamma = 1, bn.beta = 0.
    fc_weight = 0.01 * jax.random.normal(k_w, (dim, memery_channels),
                                         dtype=jnp.float32)   # torch (out, in)
    w_t = fc_weight.T                                          # (C, dim)
    fc_bias = jnp.zeros((dim,), dtype=jnp.float32)
    bn_gamma = jnp.ones((dim,), dtype=jnp.float32)
    bn_beta = jnp.zeros((dim,), dtype=jnp.float32)
    params = (w_t, fc_bias, bn_gamma, bn_beta)

    # Reference first (the kernel aliases the embeddings buffer to its output).
    ref = reference_forward(embeddings, noise_maps, num_embs_per_map, params)
    ref = jax.block_until_ready(ref)

    out = linear_projection_forward(embeddings, noise_maps, num_embs_per_map,
                                    params)
    out = jax.block_until_ready(out)

    # TODO(synk): BatchNorm1d running_mean/running_var updates are not emitted;
    # if the training loop needs them, compute them separately (running_mean
    # must add back the dropped fc bias).
    np.testing.assert_allclose(np.asarray(out), np.asarray(ref),
                               rtol=1e-4, atol=1e-4)
    print("KERNEL_OK")
</pallas_src>

<mosaic_0001>
module attributes {stable_mosaic.version = 11 : i64} {
  func.func @_fused_proj_kernel(%arg0: i32, %arg1: memref<8x256xf32, #tpu.memory_space<vmem>>, %arg2: memref<4x32xf32, #tpu.memory_space<vmem>>, %arg3: memref<1x32xf32, #tpu.memory_space<vmem>>, %arg4: memref<1x32xf32, #tpu.memory_space<vmem>>, %arg5: memref<8x32xf32, #tpu.memory_space<vmem>>, %arg6: memref<8x32xf32, #tpu.memory_space<vmem>>) attributes {dimension_semantics = [#tpu.dimension_semantics<arbitrary>], iteration_bounds = array<i64: 1>, scalar_prefetch = 0 : i64, scratch_operands = 0 : i64, tpu.core_type = #tpu.core_type<tc>, window_params = [{pipeline_mode = #tpu.pipeline_mode<synchronous>, transform_indices = @transform_0, window_bounds = array<i64: 8, 256>}, {pipeline_mode = #tpu.pipeline_mode<synchronous>, transform_indices = @transform_1, window_bounds = array<i64: 4, 32>}, {pipeline_mode = #tpu.pipeline_mode<synchronous>, transform_indices = @transform_2, window_bounds = array<i64: 1, 32>}, {pipeline_mode = #tpu.pipeline_mode<synchronous>, transform_indices = @transform_3, window_bounds = array<i64: 1, 32>}, {pipeline_mode = #tpu.pipeline_mode<synchronous>, transform_indices = @transform_4, window_bounds = array<i64: 8, 32>}, {pipeline_mode = #tpu.pipeline_mode<synchronous>, transform_indices = @transform_5, window_bounds = array<i64: 8, 32>}]} {
    %c0 = arith.constant 0 : index
    %c0_0 = arith.constant 0 : index
    %0 = vector.load %arg1[%c0, %c0_0] : memref<8x256xf32, #tpu.memory_space<vmem>>, vector<8x256xf32>
    %cst = arith.constant dense<0xFF800000> : vector<8xf32>
    %1 = vector.multi_reduction <maximumf>, %0, %cst [1] : vector<8x256xf32> to vector<8xf32>
    %2 = vector.shape_cast %1 : vector<8xf32> to vector<8x1xf32>
    %3 = vector.extract_strided_slice %2 {offsets = [0, 0], sizes = [1, 1], strides = [1, 1]} : vector<8x1xf32> to vector<1x1xf32>
    %c0_1 = arith.constant 0 : index
    %c0_2 = arith.constant 0 : index
    %4 = vector.load %arg2[%c0_1, %c0_2] : memref<4x32xf32, #tpu.memory_space<vmem>>, vector<1x32xf32>
    %5 = vector.broadcast %3 : vector<1x1xf32> to vector<1x32xf32>
    %6 = arith.mulf %5, %4 : vector<1x32xf32>
    %7 = vector.extract_strided_slice %2 {offsets = [1, 0], sizes = [1, 1], strides = [1, 1]} : vector<8x1xf32> to vector<1x1xf32>
    %c1 = arith.constant 1 : index
    %c0_3 = arith.constant 0 : index
    %8 = vector.load %arg2[%c1, %c0_3] : memref<4x32xf32, #tpu.memory_space<vmem>>, vector<1x32xf32>
    %9 = vector.broadcast %7 : vector<1x1xf32> to vector<1x32xf32>
    %10 = arith.mulf %9, %8 : vector<1x32xf32>
    %11 = arith.addf %6, %10 : vector<1x32xf32>
    %12 = vector.extract_strided_slice %2 {offsets = [2, 0], sizes = [1, 1], strides = [1, 1]} : vector<8x1xf32> to vector<1x1xf32>
    %c2 = arith.constant 2 : index
    %c0_4 = arith.constant 0 : index
    %13 = vector.load %arg2[%c2, %c0_4] : memref<4x32xf32, #tpu.memory_space<vmem>>, vector<1x32xf32>
    %14 = vector.broadcast %12 : vector<1x1xf32> to vector<1x32xf32>
    %15 = arith.mulf %14, %13 : vector<1x32xf32>
    %16 = arith.addf %11, %15 : vector<1x32xf32>
    %17 = vector.extract_strided_slice %2 {offsets = [3, 0], sizes = [1, 1], strides = [1, 1]} : vector<8x1xf32> to vector<1x1xf32>
    %c3 = arith.constant 3 : index
    %c0_5 = arith.constant 0 : index
    %18 = vector.load %arg2[%c3, %c0_5] : memref<4x32xf32, #tpu.memory_space<vmem>>, vector<1x32xf32>
    %19 = vector.broadcast %17 : vector<1x1xf32> to vector<1x32xf32>
    %20 = arith.mulf %19, %18 : vector<1x32xf32>
    %21 = arith.addf %16, %20 : vector<1x32xf32>
    %22 = vector.extract_strided_slice %2 {offsets = [4, 0], sizes = [1, 1], strides = [1, 1]} : vector<8x1xf32> to vector<1x1xf32>
    %c0_6 = arith.constant 0 : index
    %c0_7 = arith.constant 0 : index
    %23 = vector.load %arg2[%c0_6, %c0_7] : memref<4x32xf32, #tpu.memory_space<vmem>>, vector<1x32xf32>
    %24 = vector.broadcast %22 : vector<1x1xf32> to vector<1x32xf32>
    %25 = arith.mulf %24, %23 : vector<1x32xf32>
    %26 = vector.extract_strided_slice %2 {offsets = [5, 0], sizes = [1, 1], strides = [1, 1]} : vector<8x1xf32> to vector<1x1xf32>
    %c1_8 = arith.constant 1 : index
    %c0_9 = arith.constant 0 : index
    %27 = vector.load %arg2[%c1_8, %c0_9] : memref<4x32xf32, #tpu.memory_space<vmem>>, vector<1x32xf32>
    %28 = vector.broadcast %26 : vector<1x1xf32> to vector<1x32xf32>
    %29 = arith.mulf %28, %27 : vector<1x32xf32>
    %30 = arith.addf %25, %29 : vector<1x32xf32>
    %31 = vector.extract_strided_slice %2 {offsets = [6, 0], sizes = [1, 1], strides = [1, 1]} : vector<8x1xf32> to vector<1x1xf32>
    %c2_10 = arith.constant 2 : index
    %c0_11 = arith.constant 0 : index
    %32 = vector.load %arg2[%c2_10, %c0_11] : memref<4x32xf32, #tpu.memory_space<vmem>>, vector<1x32xf32>
    %33 = vector.broadcast %31 : vector<1x1xf32> to vector<1x32xf32>
    %34 = arith.mulf %33, %32 : vector<1x32xf32>
    %35 = arith.addf %30, %34 : vector<1x32xf32>
    %36 = vector.extract_strided_slice %2 {offsets = [7, 0], sizes = [1, 1], strides = [1, 1]} : vector<8x1xf32> to vector<1x1xf32>
    %c3_12 = arith.constant 3 : index
    %c0_13 = arith.constant 0 : index
    %37 = vector.load %arg2[%c3_12, %c0_13] : memref<4x32xf32, #tpu.memory_space<vmem>>, vector<1x32xf32>
    %38 = vector.broadcast %36 : vector<1x1xf32> to vector<1x32xf32>
    %39 = arith.mulf %38, %37 : vector<1x32xf32>
    %40 = arith.addf %35, %39 : vector<1x32xf32>
    %cst_14 = arith.constant 3.750000e-01 : f32
    %41 = vector.broadcast %cst_14 : f32 to vector<1x32xf32>
    %42 = arith.mulf %21, %41 : vector<1x32xf32>
    %cst_15 = arith.constant 6.250000e-01 : f32
    %43 = vector.broadcast %cst_15 : f32 to vector<1x32xf32>
    %44 = arith.mulf %40, %43 : vector<1x32xf32>
    %45 = arith.addf %42, %44 : vector<1x32xf32>
    %46 = arith.subf %21, %45 : vector<1x32xf32>
    %47 = arith.mulf %46, %46 : vector<1x32xf32>
    %cst_16 = arith.constant 3.750000e-01 : f32
    %48 = vector.broadcast %cst_16 : f32 to vector<1x32xf32>
    %49 = arith.mulf %47, %48 : vector<1x32xf32>
    %50 = arith.subf %40, %45 : vector<1x32xf32>
    %51 = arith.mulf %50, %50 : vector<1x32xf32>
    %cst_17 = arith.constant 6.250000e-01 : f32
    %52 = vector.broadcast %cst_17 : f32 to vector<1x32xf32>
    %53 = arith.mulf %51, %52 : vector<1x32xf32>
    %54 = arith.addf %49, %53 : vector<1x32xf32>
    %c0_18 = arith.constant 0 : index
    %c0_19 = arith.constant 0 : index
    %55 = vector.load %arg3[%c0_18, %c0_19] : memref<1x32xf32, #tpu.memory_space<vmem>>, vector<1x32xf32>
    %cst_20 = arith.constant 9.99999974E-6 : f32
    %56 = vector.broadcast %cst_20 : f32 to vector<1x32xf32>
    %57 = arith.addf %54, %56 : vector<1x32xf32>
    %58 = math.rsqrt %57 : vector<1x32xf32>
    %59 = arith.mulf %55, %58 : vector<1x32xf32>
    %c0_21 = arith.constant 0 : index
    %c0_22 = arith.constant 0 : index
    %60 = vector.load %arg4[%c0_21, %c0_22] : memref<1x32xf32, #tpu.memory_space<vmem>>, vector<1x32xf32>
    %61 = arith.mulf %45, %59 : vector<1x32xf32>
    %62 = arith.subf %60, %61 : vector<1x32xf32>
    %63 = arith.mulf %21, %59 : vector<1x32xf32>
    %64 = arith.addf %63, %62 : vector<1x32xf32>
    %c0_23 = arith.constant 0 : index
    %c0_24 = arith.constant 0 : index
    %65 = vector.load %arg5[%c0_23, %c0_24] : memref<8x32xf32, #tpu.memory_space<vmem>>, vector<3x32xf32>
    %66 = vector.broadcast %64 : vector<1x32xf32> to vector<3x32xf32>
    %67 = arith.addf %65, %66 : vector<3x32xf32>
    %c0_25 = arith.constant 0 : index
    %c0_26 = arith.constant 0 : index
    %68 = vector.load %arg6[%c0_25, %c0_26] : memref<8x32xf32, #tpu.memory_space<vmem>>, vector<3x32xf32>
    tpu.vector_store %arg6[%c0_25, %c0_26], %67 {strides = array<i32>} : memref<8x32xf32, #tpu.memory_space<vmem>>, vector<3x32xf32>,
    %69 = arith.mulf %40, %59 : vector<1x32xf32>
    %70 = arith.addf %69, %62 : vector<1x32xf32>
    %c3_27 = arith.constant 3 : index
    %c0_28 = arith.constant 0 : index
    %71 = vector.load %arg5[%c3_27, %c0_28] : memref<8x32xf32, #tpu.memory_space<vmem>>, vector<5x32xf32>
    %72 = vector.broadcast %70 : vector<1x32xf32> to vector<5x32xf32>
    %73 = arith.addf %71, %72 : vector<5x32xf32>
    %c3_29 = arith.constant 3 : index
    %c0_30 = arith.constant 0 : index
    %74 = vector.load %arg6[%c3_29, %c0_30] : memref<8x32xf32, #tpu.memory_space<vmem>>, vector<5x32xf32>
    tpu.vector_store %arg6[%c3_29, %c0_30], %73 {strides = array<i32>} : memref<8x32xf32, #tpu.memory_space<vmem>>, vector<5x32xf32>,
    return
  }
  func.func @transform_0(%arg0: i32) -> (i32, i32) {
    %c0_i32 = arith.constant 0 : i32
    %c0_i32_0 = arith.constant 0 : i32
    %c0_i32_1 = arith.constant 0 : i32
    return %c0_i32, %c0_i32_0 : i32, i32
  }
  func.func @transform_1(%arg0: i32) -> (i32, i32) {
    %c0_i32 = arith.constant 0 : i32
    %c0_i32_0 = arith.constant 0 : i32
    %c0_i32_1 = arith.constant 0 : i32
    return %c0_i32, %c0_i32_0 : i32, i32
  }
  func.func @transform_2(%arg0: i32) -> (i32, i32) {
    %c0_i32 = arith.constant 0 : i32
    %c0_i32_0 = arith.constant 0 : i32
    %c0_i32_1 = arith.constant 0 : i32
    return %c0_i32, %c0_i32_0 : i32, i32
  }
  func.func @transform_3(%arg0: i32) -> (i32, i32) {
    %c0_i32 = arith.constant 0 : i32
    %c0_i32_0 = arith.constant 0 : i32
    %c0_i32_1 = arith.constant 0 : i32
    return %c0_i32, %c0_i32_0 : i32, i32
  }
  func.func @transform_4(%arg0: i32) -> (i32, i32) {
    %c0_i32 = arith.constant 0 : i32
    %c0_i32_0 = arith.constant 0 : i32
    %c0_i32_1 = arith.constant 0 : i32
    return %c0_i32, %c0_i32_0 : i32, i32
  }
  func.func @transform_5(%arg0: i32) -> (i32, i32) {
    %c0_i32 = arith.constant 0 : i32
    %c0_i32_0 = arith.constant 0 : i32
    %c0_i32_1 = arith.constant 0 : i32
    return %c0_i32, %c0_i32_0 : i32, i32
  }
}

</mosaic_0001>

<bundles_post_ra>
// kernel: tpu_custom_call.1
= control target key start
LH: loop header
LB: loop body
LE: loop exit
PB: predicated region body
PF: predicated region fallthrough
CT: control target
= control target key end

     0   :  { %10 = vsyncpa [#allocation3], 0  ;;  %s318_s0 = inlined_call_operand.vmem [shape: f32[8,256], index: 0, kind: input, shape index: {}]   ;;  %s319_s1 = inlined_call_operand.hbm [shape: f32[4,32], index: 1, kind: input, shape index: {}]   ;;  %s320_s2 = inlined_call_operand.vmem [shape: f32[1,32], index: 2, kind: input, shape index: {}]   ;;  %s321_s3 = inlined_call_operand.vmem [shape: f32[1,32], index: 3, kind: input, shape index: {}]   ;;  %s322_s4 = inlined_call_operand.hbm [shape: f32[8,32], index: 4, kind: input, shape index: {}, may-alias: {4,5}]   ;;  %s323_s5 = inlined_call_operand.hbm [shape: f32[8,32], index: 5, kind: output, shape index: {}, may-alias: {4,5}]  }
   0x1   :  { %11 = vsyncpa [#allocation6], 0 }
   0x2   :  { %12 = vsyncpa [#allocation4], 0  ;;  %s20_s20 = sshll.u32 %s319_s1, 4  ;;  %s264_s21 = smov [#allocation2]   ;;  %s21_s20 = int_to_ptr.hbm [resolvable:$true] %s20_s20 }
   0x3   :  { %s22_s22 = sshll.u32 %s264_s21, 4  ;;  %s35_s25 = sshll.u32 %s322_s4, 4  ;;  %s23_s22 = int_to_ptr.vmem [resolvable:$true] %s22_s22  ;;  %s36_s25 = int_to_ptr.hbm [resolvable:$true] %s35_s25 }
   0x4   :  { %25 = dma.hbm_to_vmem [thread:$0]  %s21_s20, 64, %s23_s22, [#allocation3]  }
   0x5   :  { %s265_s26 = smov [#allocation5]  }
   0x6   :  { %s37_s27 = sshll.u32 %s265_s26, 4  ;;  %s38_s27 = int_to_ptr.vmem [resolvable:$true] %s37_s27 }
   0x7   :  { %40 = dma.hbm_to_vmem [thread:$0]  %s36_s25, 128, %s38_s27, [#allocation6]  }
   0x8   :  { %258 = dma.done.wait [#allocation3], 64  }
   0x9   :  { %259 = vsyncadd [#allocation3], 4294967232 }
   0xa   :  { %260 = dma.done.wait [#allocation6], 128  }
   0xb   :  { %261 = vsyncadd [#allocation6], 4294967168  ;;  %v49_v0 = vld [vmem:[%s318_s0] sm:$0xff]  ;;  %v50_v1 = vld [vmem:[%s318_s0 + $0x8] sm:$0xff]  ;;  %vm148_vm3 = vcmask 256000   ;;  %s170_s11 = sshll.u32 %s323_s5, 4  ;;  %s171_s11 = int_to_ptr.hbm [resolvable:$true] %s170_s11 }
   0xc   :  { %v51_v2 = vmax.f32 %v49_v0, %v50_v1  ;;  %v56_v3 = vld [vmem:[#allocation2 + $0x1] sm:$0x1]  ;;  %v65_v4 = vld [vmem:[#allocation2 + $0x2] sm:$0x1]  ;;  %v54_v5 = vld [vmem:[#allocation2] sm:$0x1] }
   0xd   :  { %v58_v6 = vrot.slane %v56_v3, 7  ;;  %v67_v7 = vrot.slane %v65_v4, 6  ;;  %v74_v8 = vld [vmem:[#allocation2 + $0x3] sm:$0x1]  ;;  %v87_v9 = vrot.slane %v56_v3, 3  ;;  %v94_v10 = vrot.slane %v65_v4, 2 }
   0xe   :  { %52 = vmax.xlane.f32.xlu0 %v51_v2  ;;  %v76_v12 = vrot.slane %v74_v8, 5  ;;  %v84_v13 = vrot.slane %v54_v5, 4  ;;  %v101_v14 = vrot.slane %v74_v8, 1  ;;  %v127_v54 = vld [vmem:[%s320_s2] sm:$0x1]  ;;  %s266_s2 = smov [#allocation7]  }
   0xf   :  { %v140_v58 = vld [vmem:[%s321_s3] sm:$0x1]  ;;  %v145_v2 = vld [vmem:[#allocation5] sm:$0x7]  ;;  %s168_s8 = sshll.u32 %s266_s2, 4  ;;  %vm161_vm4 = vcmask 258048   ;;  %s169_s8 = int_to_ptr.vmem [resolvable:$true] %s168_s8 }
  0x81   :  { %v53_v11 = vpop.xlane.xlu0 %52 }
  0x82   :  { %v60_v15 = vmul.f32 %v58_v6, %v53_v11  ;;  %v69_v16 = vmul.f32 %v67_v7, %v53_v11  ;;  %v89_v17 = vmul.f32 %v87_v9, %v53_v11  ;;  %v96_v18 = vmul.f32 %v94_v10, %v53_v11 }
  0x83   :  { %v55_v19 = vmul.f32 %v54_v5, %v53_v11  ;;  %v78_v21 = vmul.f32 %v76_v12, %v53_v11  ;;  %v86_v22 = vmul.f32 %v84_v13, %v53_v11  ;;  %v103_v24 = vmul.f32 %v101_v14, %v53_v11  ;;  %v158_v5 = vld [vmem:[#allocation5 + $0x3] sm:$0x1f] }
  0x84   :  { %v62_v20 = vrot.slane %v60_v15, 1  ;;  %v91_v23 = vrot.slane %v89_v17, 1  ;;  %v71_v26 = vrot.slane %v69_v16, 2  ;;  %v98_v28 = vrot.slane %v96_v18, 2 }
  0x85   :  { %v80_v30 = vrot.slane %v78_v21, 3  ;;  %v105_v32 = vrot.slane %v103_v24, 3 }
  0x86   :  { %v64_v25 = vadd.f32 %v62_v20, %v55_v19  ;;  %v93_v27 = vadd.f32 %v91_v23, %v86_v22 }
  0x88   :  { %v73_v29 = vadd.f32 %v71_v26, %v64_v25  ;;  %v100_v31 = vadd.f32 %v98_v28, %v93_v27 }
  0x8a   :  { %v82_v33 = vadd.f32 %v80_v30, %v73_v29  ;;  %v107_v34 = vadd.f32 %v105_v32, %v100_v31 }
  0x8c   :  { %v109_v35 = vmul.f32 0.625, %v107_v34  ;;  %v108_v36 = vmul.f32 0.375, %v82_v33 }
  0x8e   :  { %v111_v37 = vrot.slane %v109_v35, 4 }
  0x90   :  { %v113_v38 = vadd.f32 %v111_v37, %v108_v36 }
  0x92   :  { %v114_v39 = vsub.f32 %v82_v33, %v113_v38  ;;  %v118_v40 = vrot.slane %v113_v38, 4 }
  0x94   :  { %v120_v41 = vsub.f32 %v107_v34, %v118_v40  ;;  %v115_v42 = vmul.f32 %v114_v39, %v114_v39 }
  0x96   :  { %v121_v43 = vmul.f32 %v120_v41, %v120_v41  ;;  %v116_v45 = vmul.f32 0.375, %v115_v42 }
  0x98   :  { %v122_v44 = vmul.f32 0.625, %v121_v43 }
  0x9a   :  { %v124_v46 = vrot.slane %v122_v44, 4 }
  0x9c   :  { %v126_v47 = vadd.f32 %v124_v46, %v116_v45 }
  0x9e   :  { %v128_v48 = vadd.f32 1e-05, %v126_v47 }
  0xa0   :  { %184 = vrsqrt.f32 %v128_v48  ;;  %vm135_vm1 = vweird.f32 %v128_v48 }
  0xa6   :  { %v185_v49 = vpop.eup %184 }
  0xa7   :  { %v130_v50 = vmul.f32 %v185_v49, %v128_v48  ;;  %vm136_vm0 = vweird.f32 %v185_v49 }
  0xa8   :  { %vm137_vm2 = vmor %vm135_vm1, %vm136_vm0 }
  0xa9   :  { %v131_v51 = vmul.f32 %v185_v49, %v130_v50 }
  0xab   :  { %v132_v52 = vmul.f32 0.5, %v131_v51 }
  0xad   :  { %v133_v53 = vsub.f32 1.5, %v132_v52 }
  0xaf   :  { %v134_v55 = vmul.f32 %v185_v49, %v133_v53 }
  0xb1   :  { %v138_v56 = vsel %vm137_vm2, %v185_v49, %v134_v55 }
  0xb2   :  { %v139_v57 = vmul.f32 %v138_v56, %v127_v54 }
  0xb4   :  { %v141_v59 = vmul.f32 %v139_v57, %v113_v38  ;;  %v151_v60 = vperm.slane %v139_v57, 0  ;;  %v143_v62 = vmul.f32 %v139_v57, %v82_v33 }
  0xb6   :  { %v142_v61 = vsub.f32 %v140_v58, %v141_v59  ;;  %v153_v0 = vmul.f32 %v151_v60, %v107_v34 }
  0xb8   :  { %v144_v63 = vadd.f32 %v143_v62, %v142_v61  ;;  %v155_v1 = vperm.slane %v142_v61, 0 }
  0xba   :  { %v146_v3 = vperm.slane %v144_v63, 0  ;;  %v157_v4 = vadd.f32 %v155_v1, %v153_v0 }
  0xbc   :  { %v147_v6 = vadd.f32 %v146_v3, %v145_v2  ;;  %v159_v7 = vperm.slane %v157_v4, 4 }
  0xbe   :  { %149 = vst.msk [vmem:[#allocation7] sm:$0x7] %vm148_vm3, %v147_v6  ;;  %v160_v8 = vadd.f32 %v159_v7, %v158_v5 }
  0xc0   :  { %162 = vst.msk [vmem:[#allocation7 + $0x3] sm:$0x1f] %vm161_vm4, %v160_v8 }
  0xc1   :  { %173 = dma.vmem_to_hbm [thread:$0]  %s169_s8, 128, %s171_s11, [#allocation4]  }
  0xc2   :  { %262 = dma.done.wait [#allocation4], 128  }
  0xc3   :  { %263 = vsyncadd [#allocation4], 4294967168 }
  0xc4   :  { %178 = vsyncpa [#allocation3], 1 }
  0xc5   :  { %179 = vsyncpa [#allocation6], 1 }
  0xc6   :  { %180 = vsyncpa [#allocation4], 1 }

</bundles_post_ra>
